<compile_context>
chip_gen: v7x
topology: tpu7x:2x2x1
jax: 0.10.0
libtpu: 0.0.40
codegen_flags: <defaults>
</compile_context>

<pallas_src>
import jax
import jax.numpy as jnp
from jax import lax
from jax.experimental import pallas as pl
from jax.experimental.pallas import tpu as pltpu


# ---------------------------------------------------------------------------
# Kernel 1: conv1/2/3 (+ folded BN, ReLU) over point tiles + global max-pool.
# grid = (B, K): axis 0 = batch ("parallel"), axis 1 = point tiles
# ("arbitrary", carries the running-max accumulator acc_ref of shape (1,1024)).
# conv3's bias+ReLU are applied once, in the finalize block.
# ---------------------------------------------------------------------------
def _feat_kernel(x_ref,
                 w1_ref, b1_ref,
                 w2_ref, b2_ref,
                 w3_ref, b3_ref,
                 feat_ref, acc_ref):
    k = pl.program_id(1)

    @pl.when(k == 0)
    def _init():
        acc_ref[...] = jnp.full_like(acc_ref, -jnp.inf)

    x = x_ref[0]                                     # (NT, 3) float32

    # conv1 (1x1) + BN1 + ReLU : (NT,3) @ (3,64).  K=3 is negligible, keep f32.
    h = jnp.dot(x, w1_ref[...], preferred_element_type=jnp.float32) + b1_ref[...]
    h = jnp.maximum(h, 0.0)

    # conv2 (1x1) + BN2 + ReLU : (NT,64) @ (64,128), bf16 in / f32 accumulate.
    h = jnp.dot(h.astype(w2_ref.dtype), w2_ref[...],
                preferred_element_type=jnp.float32) + b2_ref[...]
    h = jnp.maximum(h, 0.0)

    # conv3 (1x1) raw matmul : (NT,128) @ (128,1024).  Bias + ReLU are hoisted
    # to the finalize step (per-channel bias + monotone ReLU commute with max).
    h = jnp.dot(h.astype(w3_ref.dtype), w3_ref[...],
                preferred_element_type=jnp.float32)  # (NT, 1024) f32

    # torch.max(x, 2)[0] as a running max over the point tiles (pre-bias).
    acc_ref[...] = jnp.maximum(acc_ref[...], jnp.max(h, axis=0, keepdims=True))

    @pl.when(k == pl.num_programs(1) - 1)
    def _finalize():
        feat_ref[0] = jnp.maximum(acc_ref[...] + b3_ref[...], 0.0)   # (1, 1024)


# ---------------------------------------------------------------------------
# Kernel 2: fc1/fc2/fc3 (+ folded BN, ReLU; identity folded into bf3),
# batched over a tile of batch elements so the MXU sees M = B_tile rows.
# fc3's weight/bias are zero-padded to 128 output columns -> lane-dense store.
# ---------------------------------------------------------------------------
def _head_kernel(f_ref,
                 wf1_ref, bf1_ref,
                 wf2_ref, bf2_ref,
                 wf3_ref, bf3_ref,
                 out_ref):
    cd = wf1_ref.dtype
    f = f_ref[...]                                    # (BT, 1024) f32

    f = jnp.dot(f.astype(cd), wf1_ref[...],
                preferred_element_type=jnp.float32) + bf1_ref[...]
    f = jnp.maximum(f, 0.0)

    f = jnp.dot(f.astype(cd), wf2_ref[...],
                preferred_element_type=jnp.float32) + bf2_ref[...]
    f = jnp.maximum(f, 0.0)

    out_ref[...] = jnp.dot(f.astype(cd), wf3_ref[...],
                           preferred_element_type=jnp.float32) + bf3_ref[...]


# ---------------------------------------------------------------------------
# Wrapper
# ---------------------------------------------------------------------------
def stn3d_forward(x_bcn, params, *, nt_target=2048, bt_target=256):
    """x_bcn: (B, 3, N) float32 (PyTorch NCL layout). Returns (B, 3, 3) float32."""
    B, C, N = x_bcn.shape
    assert C == 3
    (w1, b1, w2, b2, w3, b3, wf1, bf1, wf2, bf2, wf3, bf3) = params

    # (B,3,N) -> (B,N,3): tiny HBM transpose so every kernel matmul is plain.
    x = jnp.transpose(x_bcn, (0, 2, 1))

    # --- stage 1: per-point features + global max-pool ----------------------
    NT = nt_target if N >= nt_target else N
    K = pl.cdiv(N, NT)
    n_pad = K * NT
    if n_pad != N:
        # Replicating existing points cannot change the max-pool result.
        x = jnp.pad(x, ((0, 0), (0, n_pad - N), (0, 0)), mode="edge")

    def full2(shape):
        return pl.BlockSpec(shape, lambda b, k: (0,) * len(shape))

    feat = pl.pallas_call(
        _feat_kernel,
        out_shape=jax.ShapeDtypeStruct((B, 1, 1024), jnp.float32),
        grid_spec=pltpu.PrefetchScalarGridSpec(
            num_scalar_prefetch=0,
            grid=(B, K),
            in_specs=[
                pl.BlockSpec((1, NT, 3), lambda b, k: (b, k, 0)),
                full2((3, 64)), full2((1, 64)),
                full2((64, 128)), full2((1, 128)),
                full2((128, 1024)), full2((1, 1024)),
            ],
            out_specs=pl.BlockSpec((1, 1, 1024), lambda b, k: (b, 0, 0)),
            scratch_shapes=[pltpu.VMEM((1, 1024), jnp.float32)],
        ),
        compiler_params=pltpu.CompilerParams(
            dimension_semantics=("parallel", "arbitrary"),
            vmem_limit_bytes=32 * 1024 * 1024),
    )(x, w1, b1, w2, b2, w3, b3)

    feat = feat.reshape(B, 1024)

    # --- stage 2: batched FC head --------------------------------------------
    BT = bt_target if B >= bt_target else B
    GB = pl.cdiv(B, BT)
    b_pad = GB * BT
    if b_pad != B:
        feat = jnp.pad(feat, ((0, b_pad - B), (0, 0)))   # junk rows sliced off

    def full1(shape):
        return pl.BlockSpec(shape, lambda g: (0,) * len(shape))

    out = pl.pallas_call(
        _head_kernel,
        out_shape=jax.ShapeDtypeStruct((b_pad, 128), jnp.float32),
        grid_spec=pltpu.PrefetchScalarGridSpec(
            num_scalar_prefetch=0,
            grid=(GB,),
            in_specs=[
                pl.BlockSpec((BT, 1024), lambda g: (g, 0)),
                full1((1024, 512)), full1((1, 512)),
                full1((512, 256)), full1((1, 256)),
                full1((256, 128)), full1((1, 128)),
            ],
            out_specs=pl.BlockSpec((BT, 128), lambda g: (g, 0)),
        ),
        compiler_params=pltpu.CompilerParams(
            dimension_semantics=("parallel",)),
    )(feat, wf1, bf1, wf2, bf2, wf3, bf3)

    return out[:B, :9].reshape(B, 3, 3)


# ---------------------------------------------------------------------------
# Deterministic synthetic parameters (shapes follow STN3d.__init__) with
# eval-mode BatchNorm folding, the 3x3 identity folded into fc3's bias, and
# fc3 zero-padded to 128 output columns for a lane-dense store.
# ---------------------------------------------------------------------------
def _bn_fold(key, c_out, eps=1e-5):
    kg, kb, km, kv = jax.random.split(key, 4)
    gamma = jax.random.uniform(kg, (c_out,), jnp.float32, 0.5, 1.5)
    beta = jax.random.uniform(kb, (c_out,), jnp.float32, -0.1, 0.1)
    mean = jax.random.uniform(km, (c_out,), jnp.float32, -0.1, 0.1)
    var = jax.random.uniform(kv, (c_out,), jnp.float32, 0.5, 1.5)
    scale = gamma / jnp.sqrt(var + eps)
    shift = beta - mean * scale
    return scale, shift


def make_params(seed=0, param_dtype=jnp.bfloat16):
    key = jax.random.PRNGKey(seed)
    ks = jax.random.split(key, 16)

    def layer(kw, kb, c_in, c_out, scale=0.1):
        w = jax.random.uniform(kw, (c_in, c_out), jnp.float32, -scale, scale)
        b = jax.random.uniform(kb, (c_out,), jnp.float32, -scale, scale)
        return w, b

    # conv1/2/3 (kernel_size=1 -> weight used as (c_in, c_out)), fc1/2/3
    w1, b1 = layer(ks[0], ks[1], 3, 64)
    w2, b2 = layer(ks[2], ks[3], 64, 128)
    w3, b3 = layer(ks[4], ks[5], 128, 1024)
    wf1, bf1 = layer(ks[6], ks[7], 1024, 512)
    wf2, bf2 = layer(ks[8], ks[9], 512, 256)
    wf3, bf3 = layer(ks[10], ks[11], 256, 9)

    s1, t1 = _bn_fold(ks[12], 64)
    s2, t2 = _bn_fold(ks[13], 128)
    s3, t3 = _bn_fold(ks[14], 1024)
    s4, t4 = _bn_fold(ks[15], 512)
    s5, t5 = _bn_fold(jax.random.PRNGKey(seed + 1), 256)

    def fold(w, b, s, t):
        return w * s[None, :], (b * s + t)[None, :]   # bias stored as (1, C)

    w1, b1 = fold(w1, b1, s1, t1)
    w2, b2 = fold(w2, b2, s2, t2)
    w3, b3 = fold(w3, b3, s3, t3)
    wf1, bf1 = fold(wf1, bf1, s4, t4)
    wf2, bf2 = fold(wf2, bf2, s5, t5)

    # Fold the flattened 3x3 identity into fc3's bias, then zero-pad fc3's
    # weight/bias to 128 output columns (lane-dense head output).
    iden = jnp.array([1, 0, 0, 0, 1, 0, 0, 0, 1], jnp.float32)
    bf3 = bf3 + iden
    wf3 = jnp.pad(wf3, ((0, 0), (0, 128 - 9)))        # (256, 128)
    bf3 = jnp.pad(bf3, ((0, 128 - 9)))[None, :]       # (1, 128)

    # Large weights in bf16 (MXU-native); conv1 (K=3) and biases stay f32.
    w2, w3, wf1, wf2, wf3 = (a.astype(param_dtype)
                             for a in (w2, w3, wf1, wf2, wf3))

    return (w1, b1, w2, b2, w3, b3, wf1, bf1, wf2, bf2, wf3, bf3)


def _reference(x_bcn, params):
    """Pure-JAX reference at the same compute precision as the kernels."""
    (w1, b1, w2, b2, w3, b3, wf1, bf1, wf2, bf2, wf3, bf3) = params
    cd = w2.dtype
    hp = lax.Precision.HIGHEST
    x = jnp.transpose(x_bcn, (0, 2, 1))                       # (B, N, 3)
    h = jnp.maximum(jnp.dot(x, w1, precision=hp) + b1, 0.0)
    h = jnp.maximum(jnp.dot(h.astype(cd), w2,
                            preferred_element_type=jnp.float32) + b2, 0.0)
    h = jnp.maximum(jnp.dot(h.astype(cd), w3,
                            preferred_element_type=jnp.float32) + b3, 0.0)
    g = jnp.max(h, axis=1)                                    # (B, 1024)
    f = jnp.maximum(jnp.dot(g.astype(cd), wf1,
                            preferred_element_type=jnp.float32) + bf1, 0.0)
    f = jnp.maximum(jnp.dot(f.astype(cd), wf2,
                            preferred_element_type=jnp.float32) + bf2, 0.0)
    o = jnp.dot(f.astype(cd), wf3,
                preferred_element_type=jnp.float32) + bf3     # identity in bf3
    return o[:, :9].reshape(-1, 3, 3)


if __name__ == "__main__":
    params = make_params(seed=0)
    key = jax.random.PRNGKey(0)
    k1, k2 = jax.random.split(key)

    # Small test 1: single point tile per batch element (K == 1 path).
    B, N = 2, 16
    x = jax.random.normal(k1, (B, 3, N), jnp.float32)      # PyTorch NCL layout
    out = jax.block_until_ready(stn3d_forward(x, params))
    ref = _reference(x, params)
    assert out.shape == (B, 3, 3)
    assert jnp.allclose(out, ref, atol=1e-2, rtol=1e-2), "mismatch vs reference (K=1)"

    # Small test 2: multi-tile + edge-padding path (exercises the running-max
    # accumulator and the hoisted bias/ReLU finalize): N=20, NT=8 -> K=3.
    B2, N2 = 2, 20
    x2 = jax.random.normal(k2, (B2, 3, N2), jnp.float32)
    out2 = jax.block_until_ready(stn3d_forward(x2, params, nt_target=8))
    ref2 = _reference(x2, params)
    assert out2.shape == (B2, 3, 3)
    assert jnp.allclose(out2, ref2, atol=1e-2, rtol=1e-2), "mismatch vs reference (K>1)"

    print("KERNEL_OK")
</pallas_src>

<mosaic_0001>
module attributes {stable_mosaic.version = 11 : i64} {
  func.func @_feat_kernel(%arg0: i32, %arg1: i32, %arg2: memref<1x16x3xf32, #tpu.memory_space<vmem>>, %arg3: memref<3x64xf32, #tpu.memory_space<vmem>>, %arg4: memref<1x64xf32, #tpu.memory_space<vmem>>, %arg5: memref<64x128xbf16, #tpu.memory_space<vmem>>, %arg6: memref<1x128xf32, #tpu.memory_space<vmem>>, %arg7: memref<128x1024xbf16, #tpu.memory_space<vmem>>, %arg8: memref<1x1024xf32, #tpu.memory_space<vmem>>, %arg9: memref<1x1x1024xf32, #tpu.memory_space<vmem>>, %arg10: memref<1x1024xf32, #tpu.memory_space<vmem>>) attributes {dimension_semantics = [#tpu.dimension_semantics<parallel>, #tpu.dimension_semantics<arbitrary>], iteration_bounds = array<i64: 2, 1>, scalar_prefetch = 0 : i64, scratch_operands = 1 : i64, tpu.core_type = #tpu.core_type<tc>, window_params = [{transform_indices = @transform_0, window_bounds = array<i64: 1, 16, 3>}, {pipeline_mode = #tpu.pipeline_mode<synchronous>, transform_indices = @transform_1, window_bounds = array<i64: 3, 64>}, {pipeline_mode = #tpu.pipeline_mode<synchronous>, transform_indices = @transform_2, window_bounds = array<i64: 1, 64>}, {pipeline_mode = #tpu.pipeline_mode<synchronous>, transform_indices = @transform_3, window_bounds = array<i64: 64, 128>}, {pipeline_mode = #tpu.pipeline_mode<synchronous>, transform_indices = @transform_4, window_bounds = array<i64: 1, 128>}, {pipeline_mode = #tpu.pipeline_mode<synchronous>, transform_indices = @transform_5, window_bounds = array<i64: 128, 1024>}, {pipeline_mode = #tpu.pipeline_mode<synchronous>, transform_indices = @transform_6, window_bounds = array<i64: 1, 1024>}, {transform_indices = @transform_7, window_bounds = array<i64: 1, 1, 1024>}]} {
    %c0_i32 = arith.constant 0 : i32
    %0 = arith.cmpi eq, %arg1, %c0_i32 : i32
    %1 = arith.extui %0 : i1 to i32
    %c0_i32_0 = arith.constant 0 : i32
    %2 = arith.cmpi ne, %1, %c0_i32_0 : i32
    scf.if %2 {
      %cst_24 = arith.constant 0xFF800000 : f32
      %31 = vector.broadcast %cst_24 : f32 to vector<1x1024xf32>
      %c0_25 = arith.constant 0 : index
      %c0_26 = arith.constant 0 : index
      %32 = vector.load %arg10[%c0_25, %c0_26] : memref<1x1024xf32, #tpu.memory_space<vmem>>, vector<1x1024xf32>
      tpu.vector_store %arg10[%c0_25, %c0_26], %31 {strides = array<i32>} : memref<1x1024xf32, #tpu.memory_space<vmem>>, vector<1x1024xf32>,
    } else {
    }
    %c0 = arith.constant 0 : index
    %c0_1 = arith.constant 0 : index
    %c0_2 = arith.constant 0 : index
    %3 = vector.load %arg2[%c0, %c0_1, %c0_2] : memref<1x16x3xf32, #tpu.memory_space<vmem>>, vector<1x16x3xf32>
    %4 = vector.shape_cast %3 : vector<1x16x3xf32> to vector<16x3xf32>
    %c0_3 = arith.constant 0 : index
    %c0_4 = arith.constant 0 : index
    %5 = vector.load %arg3[%c0_3, %c0_4] : memref<3x64xf32, #tpu.memory_space<vmem>>, vector<3x64xf32>
    %cst = arith.constant dense<0.000000e+00> : vector<16x64xf32>
    %6 = tpu.matmul %4, %5, %cst {dimension_numbers = #tpu.dot_dimension_numbers<[1], [0], [0], [1], [0, 0, 1, 1], [], []>} : vector<16x3xf32>, vector<3x64xf32>, vector<16x64xf32> -> vector<16x64xf32>
    %c0_5 = arith.constant 0 : index
    %c0_6 = arith.constant 0 : index
    %7 = vector.load %arg4[%c0_5, %c0_6] : memref<1x64xf32, #tpu.memory_space<vmem>>, vector<1x64xf32>
    %8 = vector.broadcast %7 : vector<1x64xf32> to vector<16x64xf32>
    %9 = arith.addf %6, %8 : vector<16x64xf32>
    %cst_7 = arith.constant 0.000000e+00 : f32
    %10 = vector.broadcast %cst_7 : f32 to vector<16x64xf32>
    %11 = arith.maximumf %9, %10 : vector<16x64xf32>
    %12 = arith.truncf %11 : vector<16x64xf32> to vector<16x64xbf16>
    %c0_8 = arith.constant 0 : index
    %c0_9 = arith.constant 0 : index
    %13 = vector.load %arg5[%c0_8, %c0_9] : memref<64x128xbf16, #tpu.memory_space<vmem>>, vector<64x128xbf16>
    %cst_10 = arith.constant dense<0.000000e+00> : vector<16x128xf32>
    %14 = tpu.matmul %12, %13, %cst_10 {dimension_numbers = #tpu.dot_dimension_numbers<[1], [0], [0], [1], [0, 0, 1, 1], [], []>} : vector<16x64xbf16>, vector<64x128xbf16>, vector<16x128xf32> -> vector<16x128xf32>
    %c0_11 = arith.constant 0 : index
    %c0_12 = arith.constant 0 : index
    %15 = vector.load %arg6[%c0_11, %c0_12] : memref<1x128xf32, #tpu.memory_space<vmem>>, vector<1x128xf32>
    %16 = vector.broadcast %15 : vector<1x128xf32> to vector<16x128xf32>
    %17 = arith.addf %14, %16 : vector<16x128xf32>
    %cst_13 = arith.constant 0.000000e+00 : f32
    %18 = vector.broadcast %cst_13 : f32 to vector<16x128xf32>
    %19 = arith.maximumf %17, %18 : vector<16x128xf32>
    %20 = arith.truncf %19 : vector<16x128xf32> to vector<16x128xbf16>
    %c0_14 = arith.constant 0 : index
    %c0_15 = arith.constant 0 : index
    %21 = vector.load %arg7[%c0_14, %c0_15] : memref<128x1024xbf16, #tpu.memory_space<vmem>>, vector<128x1024xbf16>
    %cst_16 = arith.constant dense<0.000000e+00> : vector<16x1024xf32>
    %22 = tpu.matmul %20, %21, %cst_16 {dimension_numbers = #tpu.dot_dimension_numbers<[1], [0], [0], [1], [0, 0, 1, 1], [], []>} : vector<16x128xbf16>, vector<128x1024xbf16>, vector<16x1024xf32> -> vector<16x1024xf32>
    %c0_17 = arith.constant 0 : index
    %c0_18 = arith.constant 0 : index
    %23 = vector.load %arg10[%c0_17, %c0_18] : memref<1x1024xf32, #tpu.memory_space<vmem>>, vector<1x1024xf32>
    %cst_19 = arith.constant dense<0xFF800000> : vector<1024xf32>
    %24 = vector.multi_reduction <maximumf>, %22, %cst_19 [0] : vector<16x1024xf32> to vector<1024xf32>
    %25 = vector.shape_cast %24 : vector<1024xf32> to vector<1x1024xf32>
    %26 = arith.maximumf %23, %25 : vector<1x1024xf32>
    %c0_20 = arith.constant 0 : index
    %c0_21 = arith.constant 0 : index
    %27 = vector.load %arg10[%c0_20, %c0_21] : memref<1x1024xf32, #tpu.memory_space<vmem>>, vector<1x1024xf32>
    tpu.vector_store %arg10[%c0_20, %c0_21], %26 {strides = array<i32>} : memref<1x1024xf32, #tpu.memory_space<vmem>>, vector<1x1024xf32>,
    %c0_i32_22 = arith.constant 0 : i32
    %28 = arith.cmpi eq, %arg1, %c0_i32_22 : i32
    %29 = arith.extui %28 : i1 to i32
    %c0_i32_23 = arith.constant 0 : i32
    %30 = arith.cmpi ne, %29, %c0_i32_23 : i32
    scf.if %30 {
      %c0_24 = arith.constant 0 : index
      %c0_25 = arith.constant 0 : index
      %31 = vector.load %arg10[%c0_24, %c0_25] : memref<1x1024xf32, #tpu.memory_space<vmem>>, vector<1x1024xf32>
      %c0_26 = arith.constant 0 : index
      %c0_27 = arith.constant 0 : index
      %32 = vector.load %arg8[%c0_26, %c0_27] : memref<1x1024xf32, #tpu.memory_space<vmem>>, vector<1x1024xf32>
      %33 = arith.addf %31, %32 : vector<1x1024xf32>
      %cst_28 = arith.constant 0.000000e+00 : f32
      %34 = vector.broadcast %cst_28 : f32 to vector<1x1024xf32>
      %35 = arith.maximumf %33, %34 : vector<1x1024xf32>
      %c0_29 = arith.constant 0 : index
      %c0_30 = arith.constant 0 : index
      %c0_31 = arith.constant 0 : index
      %36 = vector.load %arg9[%c0_29, %c0_30, %c0_31] : memref<1x1x1024xf32, #tpu.memory_space<vmem>>, vector<1x1x1024xf32>
      %37 = vector.shape_cast %36 : vector<1x1x1024xf32> to vector<1x1024xf32>
      %38 = vector.shape_cast %35 : vector<1x1024xf32> to vector<1x1x1024xf32>
      tpu.vector_store %arg9[%c0_29, %c0_30, %c0_31], %38 {strides = array<i32>} : memref<1x1x1024xf32, #tpu.memory_space<vmem>>, vector<1x1x1024xf32>,
    } else {
    }
    return
  }
  func.func @transform_0(%arg0: i32, %arg1: i32) -> (i32, i32, i32) {
    %c0_i32 = arith.constant 0 : i32
    %c0_i32_0 = arith.constant 0 : i32
    return %arg0, %arg1, %c0_i32 : i32, i32, i32
  }
  func.func @transform_1(%arg0: i32, %arg1: i32) -> (i32, i32) {
    %c0_i32 = arith.constant 0 : i32
    %c0_i32_0 = arith.constant 0 : i32
    %c0_i32_1 = arith.constant 0 : i32
    return %c0_i32, %c0_i32_0 : i32, i32
  }
  func.func @transform_2(%arg0: i32, %arg1: i32) -> (i32, i32) {
    %c0_i32 = arith.constant 0 : i32
    %c0_i32_0 = arith.constant 0 : i32
    %c0_i32_1 = arith.constant 0 : i32
    return %c0_i32, %c0_i32_0 : i32, i32
  }
  func.func @transform_3(%arg0: i32, %arg1: i32) -> (i32, i32) {
    %c0_i32 = arith.constant 0 : i32
    %c0_i32_0 = arith.constant 0 : i32
    %c0_i32_1 = arith.constant 0 : i32
    return %c0_i32, %c0_i32_0 : i32, i32
  }
  func.func @transform_4(%arg0: i32, %arg1: i32) -> (i32, i32) {
    %c0_i32 = arith.constant 0 : i32
    %c0_i32_0 = arith.constant 0 : i32
    %c0_i32_1 = arith.constant 0 : i32
    return %c0_i32, %c0_i32_0 : i32, i32
  }
  func.func @transform_5(%arg0: i32, %arg1: i32) -> (i32, i32) {
    %c0_i32 = arith.constant 0 : i32
    %c0_i32_0 = arith.constant 0 : i32
    %c0_i32_1 = arith.constant 0 : i32
    return %c0_i32, %c0_i32_0 : i32, i32
  }
  func.func @transform_6(%arg0: i32, %arg1: i32) -> (i32, i32) {
    %c0_i32 = arith.constant 0 : i32
    %c0_i32_0 = arith.constant 0 : i32
    %c0_i32_1 = arith.constant 0 : i32
    return %c0_i32, %c0_i32_0 : i32, i32
  }
  func.func @transform_7(%arg0: i32, %arg1: i32) -> (i32, i32, i32) {
    %c0_i32 = arith.constant 0 : i32
    %c0_i32_0 = arith.constant 0 : i32
    %c0_i32_1 = arith.constant 0 : i32
    return %arg0, %c0_i32, %c0_i32_0 : i32, i32, i32
  }
}

</mosaic_0001>

<bundles_post_ra>
// kernel: tpu_custom_call.1
= control target key start
LH: loop header
LB: loop body
LE: loop exit
PB: predicated region body
PF: predicated region fallthrough
CT: control target
= control target key end

     0   :  { %12 = vsyncpa [#allocation4], 0  ;;  %s1825_s0 = inlined_call_operand.vmem [shape: f32[2,16,3], index: 0, kind: input, shape index: {}]   ;;  %s1826_s1 = inlined_call_operand.vmem [shape: f32[3,64], index: 1, kind: input, shape index: {}]   ;;  %s1827_s2 = inlined_call_operand.vmem [shape: f32[1,64], index: 2, kind: input, shape index: {}]   ;;  %s1828_s3 = inlined_call_operand.vmem [shape: bf16[64,128], index: 3, kind: input, shape index: {}]   ;;  %s1829_s4 = inlined_call_operand.vmem [shape: f32[1,128], index: 4, kind: input, shape index: {}]   ;;  %s1830_s5 = inlined_call_operand.hbm [shape: bf16[128,1024], index: 5, kind: input, shape index: {}]   ;;  %s1831_s6 = inlined_call_operand.vmem [shape: f32[1,1024], index: 6, kind: input, shape index: {}]   ;;  %s1832_s7 = inlined_call_operand.hbm [shape: f32[2,1,1024], index: 7, kind: output, shape index: {}]  }
   0x1   :  { %13 = vsyncpa [#allocation5], 0 }
   0x2   :  { %15 = vsyncpa [#allocation5 + $0x1], 0  ;;  %s1645_s24 = smov 0   ;;  %s1647_s25 = smov 0  }
   0x3   :  { %s1649_s26 = smov 0   ;;  %s1651_s27 = smov 0  }
   0x4   :  { %s1653_s28 = smov 0   ;;  %s1655_s29 = smov 0  }
   0x5 LB: > { %s1293_s30 = sadd.s32 4294967295, %s1595_s29   ;;  %s1294_s8 = sadd.s32 4294967294, %s1595_s29   ;;  %s1595_s29 = sphi %s1655_s29, %s21_s29   ;;  %s1591_s28 = sphi %s1653_s28, %s1850_s28   ;;  %s1587_s27 = sphi %s1651_s27, %s1849_s27   ;;  %s1583_s26 = sphi %s1649_s26, %s1848_s26   ;;  %s1579_s25 = sphi %s1647_s25, %s1847_s25   ;;  %s1575_s24 = sphi %s1645_s24, %s1846_s24  }
   0x6   : > { %s33_s9 = sadd.s32 1, %s1591_s28  ;;  %s194_s10 = sadd.s32 1, %s1583_s26 }
   0x7   : > { %p35_p0 = scmp.ge.s32.totalorder %s33_s9, 2  ;;  %p204_p1 = scmp.ne.s32.totalorder %s1583_s26, %s1579_s25 }
   0x8   : > { %p205_p2 = scmp.eq.s32.totalorder %s1293_s30, 1  ;;  %p210_p3 = scmp.ne.s32.totalorder %s1579_s25, %s1575_s24 }
   0x9   : > { %s1852_s9 = smov (%p35_p0, %s33_s9), 0  ;;  %p211_p5 = scmp.eq.s32.totalorder %s1294_s8, 1 }
   0xa   : > { %p1685_p4 = por %p205_p2, %p204_p1  ;;  %s191_s12 = ssub.s32 %s1591_s28, %s1852_s9 }
   0xb   : > { %p1295_p6 = scmp.ge.s32.totalorder %s1595_s29, 1  ;;  %p192_p7 = scmp.eq.s32.totalorder %s191_s12, 0 }
   0xc   : > { %s1837_s11 = scalar_select %p1685_p4, 1, 0 }
   0xd   : > { %p1692_p8 = por %p211_p5, %p210_p3  ;;  %p218_p9 = scmp.lt.s32.totalorder %s1595_s29, 3 }
   0xe   : > { %s1698_s14 = scalar_select %p192_p7, %s1583_s26, %s194_s10  }
   0xf   : > { %s1838_s13 = scalar_select %p1692_p8, 1, 0 }
  0x10   : > { %p1700_p10 = pnand %p1295_p6, %p218_p9  ;;  %p1704_p11 = scmp.eq.s32.totalorder %s1293_s30, 0 }
  0x11   : > { %s1597_s17 = smov [#allocation3]   ;;  %s1485_s22 = scalar_lea.hbm %s1830_s5, 8192 }
  0x12   : > { %s1839_s15 = scalar_select %p1700_p10, 1, 0 }
  0x13   : > { %s1840_s16 = scalar_select %p1704_p11, 1, 0 }
  0x14   : > { %p1415_p12 = pneg %p1700_p10  ;;  %s242_s18 = sshll.u32 %s1597_s17, 4  ;;  %s243_s18 = int_to_ptr.vmem [resolvable:$true] %s242_s18 }
  0x15   : > { %p1486_p0 = scmp.ne.s32.totalorder %s1830_s5, %s1485_s22  ;;  %p1492_p5 = scmp.lt.u32.totalorder %s1485_s22, %s1830_s5 }
  0x16   : > { %p1712_p13 = pnand %p1704_p11, %p1415_p12 }
  0x18   : > { %p1487_p1 = pneg %p1712_p13 }
  0x1a   : > { %p1488_p2 = pnand %p1487_p1, %p1486_p0 }
  0x1c   : > { %p1489_p3 = pneg %p1488_p2 }
  0x1e   : > { %p1494_p6 = pnand %p1492_p5, %p1489_p3 }
  0x20   : > { %1497 = shalt.err (!%p1494_p6)
}
  0x21   : > { %s1498_s12 = scalar_lea.vmem %s243_s18, 8192  ;;  %p1506_p8 = scmp.lt.s32.totalorder %s243_s18, %s243_s18 }
  0x22   : > { %p1499_p7 = scmp.ne.s32.totalorder %s243_s18, %s1498_s12  ;;  %p1507_p4 = scmp.lt.s32.totalorder %s1498_s12, %s1498_s12 }
  0x24   : > { %p1501_p9 = pnand %p1499_p7, %p1487_p1  ;;  %p1508_p11 = por %p1507_p4, %p1506_p8 }
  0x26   : > { %p1502_p12 = pneg %p1501_p9 }
  0x28   : > { %p1509_p10 = pnand %p1508_p11, %p1502_p12 }
  0x2a   : > { %1512 = shalt.err (!%p1509_p10)
}
  0x2b   : > { %s1598_s17 = smov 512   ;;  %s1599_s20 = smov 32  }
  0x2c   : > { %1418 = dma.hbm_to_vmem [thread:$0]  (!%p1712_p13), %s1830_s5, 8192, %s243_s18, [#allocation4], %s1598_s17, %s1598_s17, %s1599_s20  }
  0x2d   : > { %p1842_p0 = scmp.ne.s32.totalorder %s1839_s15, 0 }
  0x2e   : > { %p1843_p2 = scmp.ne.s32.totalorder (!%p1842_p0), %s1840_s16, 0 }
  0x2f   : > { %274 = sbr.rel (%p1842_p0) target bundleno = 791 (0x317), region = 48 }
  0x36   : > { %1566 = dma.done.wait (%p1843_p2), [#allocation4], 8192  }
  0x37   : > { %1568 = vsyncadd (%p1843_p2), [#allocation4], 4294959104  ;;  %p311_p4 = scmp.lt.s32.totalorder %s1587_s27, 1  ;;  %v1600_v0 = vmov 0.0   ;;  %vm343_vm0 = vcmask 1042432   ;;  %vm336_vm1 = vcmask 23552  }
  0x38   : > { %1397 = vmatprep.subr.bf16.mxu1 %v1600_v0  ;;  %v328_v1 = vld [vmem:[%s1826_s1] sm:$0x7]  ;;  %v1482_v5 = vld [vmem:[%s1828_s3 + $0x8] sm:$0xff]   ;;  %v1483_v6 = vld [vmem:[%s1828_s3 + $0x10] sm:$0xff]   ;;  %vm1601_vm2 = vmmov 0   ;;  %vm464_vm3 = vcmask 523264  }
  0x39   : > { %s312_s22 = scalar_select %p311_p4, %s1587_s27, 1  ;;  %1392 = vmatprep.subr.msk.mxu0 %vm343_vm0, %v328_v1  ;;  %v1481_v4 = vld [vmem:[%s1828_s3] sm:$0xff]   ;;  %v1484_v7 = vld [vmem:[%s1828_s3 + $0x18] sm:$0xff]   ;;  %1405 = vmatprep.mubr.msk.bf16.mxu1 %vm1601_vm2, %v1600_v0  ;;  %v513_v10 = vld [vmem:[#allocation3 + $0x8] sm:$0xff] }
  0x3a   : > { %1393 = vmatpush3.msk.msra.mxu0 %vm343_vm0, %v328_v1  ;;  %1398 = vmatpush3.bf16.msra.mxu1 %v1481_v4  ;;  %v512_v8 = vld [vmem:[#allocation3] sm:$0xff]  ;;  %v517_v13 = vld [vmem:[#allocation3 + $0x28] sm:$0xff]  ;;  %s307_s10 = sand.u32 1, %s1579_s25   ;;  %s1383_s20 = sshll.u32 %s1587_s27, 7 }
  0x3b   : > { %s1382_s19 = sshll.u32 %s312_s22, 4  ;;  %1399 = vmatprep.subr.bf16.mxu1 %v1600_v0  ;;  %v516_v9 = vld [vmem:[#allocation3 + $0x20] sm:$0xff]  ;;  %v1315_v16 = vcombine.low %v513_v10, %v517_v13  ;;  %v1316_v17 = vcombine.high %v513_v10, %v517_v13  ;;  %v521_v42 = vld [vmem:[#allocation3 + $0x48] sm:$0xff]  ;;  %s1300_s16 = sshll.u32 %s307_s10, 3 }
  0x3c   : > { %s318_s18 = scalar_lea.vmem %s1825_s0, %s1382_s19  ;;  %v1313_v11 = vcombine.low %v512_v8, %v516_v9  ;;  %v1314_v12 = vcombine.high %v512_v8, %v516_v9  ;;  %v520_v14 = vld [vmem:[#allocation3 + $0x40] sm:$0xff]  ;;  %v525_v43 = vld [vmem:[#allocation3 + $0x68] sm:$0xff]  ;;  %s309_s21 = scalar_lea.vmem [#allocation6], %s1300_s16 }
  0x3d   : > { %v326_v2 = vld [vmem:[%s318_s18] sm:$0xff]  ;;  %v327_v3 = vld [vmem:[%s318_s18 + $0x8] sm:$0xff]  ;;  %v1324_v46 = vcombine.high %v521_v42, %v525_v43  ;;  %v1323_v49 = vcombine.low %v521_v42, %v525_v43  ;;  %v534_v42 = vld [vmem:[#allocation3 + $0xb0] sm:$0xff]  ;;  %s1208_s23 = sshll.u32 %s309_s21, 4  ;;  %s1778_s30 = scalar_lea.hbm %s1832_s7, %s1383_s20  ;;  %s1780_s23 = int_to_ptr.vmem [resolvable:$true] %s1208_s23 }
  0x3e   : > { %1394 = vmatprep.mubr.msk.f32.mxu0 %vm336_vm1, %v326_v2  ;;  %1400 = vmatpush3.bf16.msra.mxu1 %v1482_v5  ;;  %v524_v15 = vld [vmem:[#allocation3 + $0x60] sm:$0xff]  ;;  %v529_v47 = vld [vmem:[#allocation3 + $0x88] sm:$0xff]  ;;  %v531_v43 = vld [vmem:[#allocation3 + $0x98] sm:$0xff]  ;;  %s1194_s8 = scalar_lea.sflag [#allocation5], %s307_s10  ;;  %s1513_s18 = scalar_lea.vmem %s1780_s23, 128 }
  0x3f   : > { %1395 = vmatmul.mubr.msk.f32.vlgmr.msra.gmra.mrb[0].mxu0 %vm336_vm1, %v327_v3  ;;  %1401 = vmatprep.subr.bf16.mxu1 %v1600_v0  ;;  %v1322_v18 = vcombine.high %v520_v14, %v524_v15  ;;  %v1321_v19 = vcombine.low %v520_v14, %v524_v15  ;;  %v528_v20 = vld [vmem:[#allocation3 + $0x80] sm:$0xff]  ;;  %v533_v48 = vld [vmem:[#allocation3 + $0xa8] sm:$0xff]  ;;  %p1514_p8 = scmp.ne.s32.totalorder %s1780_s23, %s1513_s18  ;;  %p1844_p10 = scmp.ne.s32.totalorder %s1837_s11, 0 }
  0x40   : > { %896 = vmatprep.subr.bf16.mxu0 %v1314_v12  ;;  %v532_v21 = vld [vmem:[#allocation3 + $0xa0] sm:$0xff]  ;;  %v1332_v50 = vcombine.high %v529_v47, %v533_v48  ;;  %v537_v51 = vld [vmem:[#allocation3 + $0xc8] sm:$0xff]  ;;  %v1331_v53 = vcombine.low %v529_v47, %v533_v48  ;;  %s1604_s27 = smov [#allocation6]  }
  0x41   : > { %897 = vmatpush1.bf16.msra.mxu0 %v1313_v11  ;;  %v1330_v22 = vcombine.high %v528_v20, %v532_v21  ;;  %v1329_v23 = vcombine.low %v528_v20, %v532_v21  ;;  %v536_v24 = vld [vmem:[#allocation3 + $0xc0] sm:$0xff]  ;;  %v541_v52 = vld [vmem:[#allocation3 + $0xe8] sm:$0xff]  ;;  %v519_v20 = vld [vmem:[#allocation3 + $0x38] sm:$0xff]  ;;  %p1515_p11 = pnand %p1514_p8, %p1844_p10  ;;  %s1517_s15 = sshll.u32 %s1604_s27, 4  ;;  %s1518_s15 = int_to_ptr.vmem [resolvable:$false] %s1517_s15 }
  0x42   : > { %1402 = vmatpush3.bf16.msra.mxu1 %v1483_v6  ;;  %898 = vmatprep.subr.bf16.mxu0 %v1322_v18  ;;  %v540_v25 = vld [vmem:[#allocation3 + $0xe0] sm:$0xff]  ;;  %v1340_v54 = vcombine.high %v537_v51, %v541_v52  ;;  %v545_v55 = vld [vmem:[#allocation3 + $0x108] sm:$0xff]  ;;  %v1339_v57 = vcombine.low %v537_v51, %v541_v52  ;;  %v515_v18 = vld [vmem:[#allocation3 + $0x18] sm:$0xff]  ;;  %s1519_s16 = scalar_lea.vmem %s1518_s15, 256  ;;  %p1520_p1 = scmp.lt.s32.totalorder %s1780_s23, %s1518_s15 }
  0x43   : > { %1403 = vmatprep.subr.bf16.mxu1 %v1600_v0  ;;  %v1338_v26 = vcombine.high %v536_v24, %v540_v25  ;;  %v1337_v27 = vcombine.low %v536_v24, %v540_v25  ;;  %v544_v28 = vld [vmem:[#allocation3 + $0x100] sm:$0xff]  ;;  %v549_v56 = vld [vmem:[#allocation3 + $0x128] sm:$0xff]  ;;  %v1602_v24 = vmov 0   ;;  %v539_v51 = vld [vmem:[#allocation3 + $0xd8] sm:$0xff]  ;;  %p1516_p13 = pneg %p1515_p11  ;;  %p1521_p3 = scmp.lt.s32.totalorder %s1519_s16, %s1513_s18 }
  0x44   : > { %v548_v29 = vld [vmem:[#allocation3 + $0x120] sm:$0xff]  ;;  %v1348_v58 = vcombine.high %v545_v55, %v549_v56  ;;  %v553_v59 = vld [vmem:[#allocation3 + $0x148] sm:$0xff]  ;;  %v1347_v61 = vcombine.low %v545_v55, %v549_v56  ;;  %928 = vmatprep.mubr.bf16.mxu0 %v1602_v24  ;;  %v543_v52 = vld [vmem:[#allocation3 + $0xf8] sm:$0xff] }
  0x45   : > { %899 = vmatpush1.bf16.msra.mxu0 %v1321_v19  ;;  %v1346_v30 = vcombine.high %v544_v28, %v548_v29  ;;  %v1345_v31 = vcombine.low %v544_v28, %v548_v29  ;;  %v552_v32 = vld [vmem:[#allocation3 + $0x140] sm:$0xff]  ;;  %v557_v60 = vld [vmem:[#allocation3 + $0x168] sm:$0xff]  ;;  %v1344_v56 = vcombine.high %v539_v51, %v543_v52  ;;  %p1522_p5 = por %p1521_p3, %p1520_p1 }
  0x46   : > { %1404 = vmatpush3.bf16.msra.mxu1 %v1484_v7  ;;  %900 = vmatprep.subr.bf16.mxu0 %v1330_v22  ;;  %v556_v33 = vld [vmem:[#allocation3 + $0x160] sm:$0xff]  ;;  %v1356_v62 = vcombine.high %v553_v59, %v557_v60  ;;  %v1355_v63 = vcombine.low %v553_v59, %v557_v60  ;;  %v561_v2 = vld [vmem:[#allocation3 + $0x188] sm:$0xff]  ;;  %v1319_v22 = vcombine.low %v515_v18, %v519_v20  ;;  %v547_v59 = vld [vmem:[#allocation3 + $0x118] sm:$0xff] }
  0x47   : > { %939 = vmatprep.subr.bf16.mxu1 %v1316_v17  ;;  %v1354_v34 = vcombine.high %v552_v32, %v556_v33  ;;  %v1353_v35 = vcombine.low %v552_v32, %v556_v33  ;;  %v1303_v36 = vld [vmem:[%s1827_s2] ss:$0 sm:$0xff]  ;;  %v565_v4 = vld [vmem:[#allocation3 + $0x1a8] sm:$0xff]  ;;  %v518_v17 = vld [vmem:[#allocation3 + $0x30] sm:$0xff]  ;;  %p1523_p6 = pnand %p1522_p5, %p1516_p13 }
  0x48   : > { %v560_v0 = vld [vmem:[#allocation3 + $0x180] sm:$0xff]  ;;  %v1363_v6 = vcombine.low %v561_v2, %v565_v4  ;;  %v1364_v7 = vcombine.high %v561_v2, %v565_v4  ;;  %v569_v10 = vld [vmem:[#allocation3 + $0x1c8] sm:$0xff]  ;;  %v522_v32 = vld [vmem:[#allocation3 + $0x50] sm:$0xff] }
  0x49   : > { %901 = vmatpush1.bf16.msra.mxu0 %v1329_v23  ;;  %v564_v1 = vld [vmem:[#allocation3 + $0x1a0] sm:$0xff]  ;;  %v573_v12 = vld [vmem:[#allocation3 + $0x1e8] sm:$0xff]  ;;  %v1320_v23 = vcombine.high %v515_v18, %v519_v20  ;;  %v526_v33 = vld [vmem:[#allocation3 + $0x70] sm:$0xff] }
  0x4a   : > { %902 = vmatprep.subr.bf16.mxu0 %v1338_v26  ;;  %v1362_v3 = vcombine.high %v560_v0, %v564_v1  ;;  %v1361_v5 = vcombine.low %v560_v0, %v564_v1  ;;  %v568_v8 = vld [vmem:[#allocation3 + $0x1c0] sm:$0xff]  ;;  %v1371_v14 = vcombine.low %v569_v10, %v573_v12  ;;  %v1372_v15 = vcombine.high %v569_v10, %v573_v12  ;;  %v551_v60 = vld [vmem:[#allocation3 + $0x138] sm:$0xff]  ;;  %v554_v1 = vld [vmem:[#allocation3 + $0x150] sm:$0xff] }
  0x4b   : > { %v572_v9 = vld [vmem:[#allocation3 + $0x1e0] sm:$0xff]  ;;  %v1352_v0 = vcombine.high %v547_v59, %v551_v60  ;;  %v558_v2 = vld [vmem:[#allocation3 + $0x170] sm:$0xff]  ;;  %v559_v4 = vld [vmem:[#allocation3 + $0x178] sm:$0xff] }
  0x4c   : > { %v1370_v11 = vcombine.high %v568_v8, %v572_v9  ;;  %v1369_v13 = vcombine.low %v568_v8, %v572_v9  ;;  %v1307_v25 = vld [vmem:[%s1829_s4] ss:$0 sm:$0xff]  ;;  %v562_v9 = vld [vmem:[#allocation3 + $0x190] sm:$0xff]  ;;  %v567_v12 = vld [vmem:[#allocation3 + $0x1b8] sm:$0xff] }
  0x4d   : > { %903 = vmatpush1.bf16.msra.mxu0 %v1337_v27  ;;  %v566_v10 = vld [vmem:[#allocation3 + $0x1b0] sm:$0xff]  ;;  %v575_v20 = vld [vmem:[#allocation3 + $0x1f8] sm:$0xff] }
  0x4e   : > { %904 = vmatprep.subr.bf16.mxu0 %v1346_v30  ;;  %v574_v18 = vld [vmem:[#allocation3 + $0x1f0] sm:$0xff] }
  0x51   : > { %905 = vmatpush1.bf16.msra.mxu0 %v1345_v31 }
  0x52   : > { %906 = vmatprep.subr.bf16.mxu0 %v1354_v34  ;;  %v523_v34 = vld [vmem:[#allocation3 + $0x58] sm:$0xff] }
  0x55   : > { %907 = vmatpush1.bf16.msra.mxu0 %v1353_v35  ;;  %v527_v35 = vld [vmem:[#allocation3 + $0x78] sm:$0xff] }
  0x56   : > { %908 = vmatprep.subr.bf16.mxu0 %v1362_v3  ;;  %v555_v3 = vld [vmem:[#allocation3 + $0x158] sm:$0xff] }
  0x57   : > { %v1360_v8 = vcombine.high %v555_v3, %v559_v4 }
  0x59   : > { %909 = vmatpush1.bf16.msra.mxu0 %v1361_v5 }
  0x5a   : > { %910 = vmatprep.subr.bf16.mxu0 %v1370_v11  ;;  %v563_v11 = vld [vmem:[#allocation3 + $0x198] sm:$0xff] }
  0x5d   : > { %911 = vmatpush1.bf16.msra.mxu0 %v1369_v13  ;;  %v1357_v13 = vcombine.low %v554_v1, %v558_v2 }
 0x112   : > { %v1396_v37 = vpop.f32.mrb[0].mxu0 }
 0x113   : > { %v419_v38 = vadd.f32 %v1396_v37, %v1303_v36  ;;  %v413_v39 = vpop.f32.mrb[1].mxu0 }
 0x114   : > { %v414_v40 = vadd.f32 %v1303_v36, %v413_v39  ;;  %v1326_v39 = vcombine.high %v522_v32, %v526_v33 }
 0x115   : > { %v423_v41 = vmax.f32 %v419_v38, 0.0 }
 0x116   : > { %v422_v44 = vmax.f32 %v414_v40, 0.0  ;;  %v1328_v40 = vcombine.high %v523_v34, %v527_v35 }
 0x118   : > { %v424_v45 = vpack.c.bf16 %v423_v41, %v422_v44  ;;  %v530_v41 = vld [vmem:[#allocation3 + $0x90] sm:$0xff]  ;;  %v535_v44 = vld [vmem:[#allocation3 + $0xb8] sm:$0xff] }
 0x119   : > { %v1334_v47 = vcombine.high %v530_v41, %v534_v42  ;;  %v1336_v48 = vcombine.high %v531_v43, %v535_v44 }
 0x11a   : > { %1406 = vmatmul.mubr.msk.bf16.vlgmr.msra.gmra.mrb[0].mxu1 %vm464_vm3, %v424_v45  ;;  %v1325_v45 = vcombine.low %v522_v32, %v526_v33 }
 0x11b   : > { %940 = vmatpush1.bf16.msra.mxu1 %v1315_v16  ;;  %v514_v16 = vld [vmem:[#allocation3 + $0x10] sm:$0xff]  ;;  %971 = vmatprep.mubr.bf16.mxu1 %v1602_v24 }
 0x11c   : > { %941 = vmatprep.subr.bf16.mxu1 %v1324_v46  ;;  %v1318_v19 = vcombine.high %v514_v16, %v518_v17  ;;  %v1317_v21 = vcombine.low %v514_v16, %v518_v17  ;;  %v1327_v46 = vcombine.low %v523_v34, %v527_v35  ;;  %v1368_v16 = vcombine.high %v563_v11, %v567_v12  ;;  %v570_v17 = vld [vmem:[#allocation3 + $0x1d0] sm:$0xff] }
 0x11e   : > { %982 = vmatprep.subr.bf16.mxu0 %v1318_v19  ;;  %v571_v19 = vld [vmem:[#allocation3 + $0x1d8] sm:$0xff] }
 0x11f   : > { %942 = vmatpush1.bf16.msra.mxu1 %v1323_v49  ;;  %v538_v49 = vld [vmem:[#allocation3 + $0xd0] sm:$0xff] }
 0x120   : > { %943 = vmatprep.subr.bf16.mxu1 %v1332_v50  ;;  %v542_v50 = vld [vmem:[#allocation3 + $0xf0] sm:$0xff] }
 0x121   : > { %v1342_v55 = vcombine.high %v538_v49, %v542_v50 }
 0x123   : > { %944 = vmatpush1.bf16.msra.mxu1 %v1331_v53  ;;  %v1333_v53 = vcombine.low %v530_v41, %v534_v42 }
 0x124   : > { %945 = vmatprep.subr.bf16.mxu1 %v1340_v54  ;;  %v1335_v54 = vcombine.low %v531_v43, %v535_v44 }
 0x127   : > { %946 = vmatpush1.bf16.msra.mxu1 %v1339_v57  ;;  %v546_v57 = vld [vmem:[#allocation3 + $0x110] sm:$0xff] }
 0x128   : > { %947 = vmatprep.subr.bf16.mxu1 %v1348_v58  ;;  %v550_v58 = vld [vmem:[#allocation3 + $0x130] sm:$0xff] }
 0x129   : > { %v1349_v5 = vcombine.low %v546_v57, %v550_v58 }
 0x12b   : > { %948 = vmatpush1.bf16.msra.mxu1 %v1347_v61  ;;  %v1341_v61 = vcombine.low %v538_v49, %v542_v50 }
 0x12c   : > { %949 = vmatprep.subr.bf16.mxu1 %v1356_v62  ;;  %v1343_v62 = vcombine.low %v539_v51, %v543_v52 }
 0x12f   : > { %950 = vmatpush1.bf16.msra.mxu1 %v1355_v63  ;;  %v1350_v63 = vcombine.high %v546_v57, %v550_v58 }
 0x130   : > { %951 = vmatprep.subr.bf16.mxu1 %v1364_v7  ;;  %v1358_v7 = vcombine.high %v554_v1, %v558_v2 }
 0x133   : > { %952 = vmatpush1.bf16.msra.mxu1 %v1363_v6  ;;  %v1351_v6 = vcombine.low %v547_v59, %v551_v60 }
 0x134   : > { %953 = vmatprep.subr.bf16.mxu1 %v1372_v15  ;;  %v1366_v15 = vcombine.high %v562_v9, %v566_v10 }
 0x137   : > { %954 = vmatpush1.bf16.msra.mxu1 %v1371_v14  ;;  %v1359_v14 = vcombine.low %v555_v3, %v559_v4 }
 0x138   : > { %1025 = vmatprep.subr.bf16.mxu1 %v1320_v23  ;;  %v1374_v23 = vcombine.high %v570_v17, %v574_v18 }
 0x1ed   : > { %v502_v26 = vpop.f32.mrb[0].mxu1 }
 0x1ee   : > { %v503_v27 = vadd.f32 %v1307_v25, %v502_v26  ;;  %v1407_v28 = vpop.f32.mrb[1].mxu1  ;;  %v1375_v26 = vcombine.low %v571_v19, %v575_v20 }
 0x1ef   : > { %v505_v29 = vpop.f32.mrb[2].mxu1 }
 0x1f0   : > { %v506_v30 = vadd.f32 %v1307_v25, %v505_v29  ;;  %v1408_v31 = vpop.f32.mrb[3].mxu1  ;;  %v509_v36 = vmax.f32 %v503_v27, 0.0  ;;  %v1373_v25 = vcombine.low %v570_v17, %v574_v18 }
 0x1f2   : > { %v510_v37 = vmax.f32 %v506_v30, 0.0 }
 0x1f4   : > { %v1764_v38 = vpack.c.bf16 %v510_v37, %v509_v36 }
 0x1f6   : > { %929 = vmatmul.mubr.bf16.vlgmr.msra.gmra.mrb[4].mxu0 %v1764_v38  ;;  %972 = vmatmul.mubr.bf16.vlgmr.msra.gmra.mrb[4].mxu1 %v1764_v38 }
 0x1f7   : > { %983 = vmatpush1.bf16.msra.mxu0 %v1317_v21  ;;  %1026 = vmatpush1.bf16.msra.mxu1 %v1319_v22  ;;  %v1365_v21 = vcombine.low %v562_v9, %v566_v10  ;;  %v1367_v22 = vcombine.low %v563_v11, %v567_v12 }
 0x1f8   : > { %984 = vmatprep.subr.bf16.mxu0 %v1326_v39  ;;  %1027 = vmatprep.subr.bf16.mxu1 %v1328_v40 }
 0x1f9   : > { %1014 = vmatprep.mubr.bf16.mxu0 %v1602_v24  ;;  %1057 = vmatprep.mubr.bf16.mxu1 %v1602_v24  ;;  %v1376_v24 = vcombine.high %v571_v19, %v575_v20 }
 0x1fb   : > { %985 = vmatpush1.bf16.msra.mxu0 %v1325_v45  ;;  %1028 = vmatpush1.bf16.msra.mxu1 %v1327_v46 }
 0x1fc   : > { %986 = vmatprep.subr.bf16.mxu0 %v1334_v47  ;;  %1029 = vmatprep.subr.bf16.mxu1 %v1336_v48  ;;  %v1140_v48 = vlaneseq }
 0x1fe   : > { %v1141_v58 = vshrl.u32 %v1140_v48, 7 }
 0x1ff   : > { %987 = vmatpush1.bf16.msra.mxu0 %v1333_v53  ;;  %1030 = vmatpush1.bf16.msra.mxu1 %v1335_v54 }
 0x200   : > { %988 = vmatprep.subr.bf16.mxu0 %v1342_v55  ;;  %1031 = vmatprep.subr.bf16.mxu1 %v1344_v56 }
 0x203   : > { %989 = vmatpush1.bf16.msra.mxu0 %v1341_v61  ;;  %1032 = vmatpush1.bf16.msra.mxu1 %v1343_v62 }
 0x204   : > { %990 = vmatprep.subr.bf16.mxu0 %v1350_v63  ;;  %1033 = vmatprep.subr.bf16.mxu1 %v1352_v0 }
 0x207   : > { %991 = vmatpush1.bf16.msra.mxu0 %v1349_v5  ;;  %1034 = vmatpush1.bf16.msra.mxu1 %v1351_v6 }
 0x208   : > { %992 = vmatprep.subr.bf16.mxu0 %v1358_v7  ;;  %1035 = vmatprep.subr.bf16.mxu1 %v1360_v8 }
 0x20b   : > { %993 = vmatpush1.bf16.msra.mxu0 %v1357_v13  ;;  %1036 = vmatpush1.bf16.msra.mxu1 %v1359_v14 }
 0x20c   : > { %994 = vmatprep.subr.bf16.mxu0 %v1366_v15  ;;  %1037 = vmatprep.subr.bf16.mxu1 %v1368_v16 }
 0x20f   : > { %995 = vmatpush1.bf16.msra.mxu0 %v1365_v21  ;;  %1038 = vmatpush1.bf16.msra.mxu1 %v1367_v22 }
 0x210   : > { %996 = vmatprep.subr.bf16.mxu0 %v1374_v23  ;;  %1039 = vmatprep.subr.bf16.mxu1 %v1376_v24 }
 0x213   : > { %997 = vmatpush1.bf16.msra.mxu0 %v1373_v25  ;;  %1040 = vmatpush1.bf16.msra.mxu1 %v1375_v26 }
 0x216   : > { %1015 = vmatmul.mubr.bf16.vlgmr.msra.gmra.mrb[8].mxu0 %v1764_v38  ;;  %1058 = vmatmul.mubr.bf16.vlgmr.msra.gmra.mrb[8].mxu1 %v1764_v38  ;;  %v1603_v38 = vmov 1966171168  }
 0x217   : > { %v1138_v47 = vunpack.c.l.s4 %v1603_v38 }
 0x219   : > { %v1139_v57 = vunpack.c.0.s8 %v1138_v47 }
 0x21b   : > { %v1142_v3 = vsub.s32 %v1139_v57, %v1141_v58 }
 0x2c9   : > { %v930_v27 = vpop.f32.mrb[4].mxu0  ;;  %v973_v28 = vpop.f32.mrb[4].mxu1 }
 0x2ca   : > { %v932_v29 = vpop.f32.mrb[5].mxu0  ;;  %v975_v30 = vpop.f32.mrb[5].mxu1 }
 0x2cb   : > { %v934_v31 = vpop.f32.mrb[6].mxu0  ;;  %v977_v32 = vpop.f32.mrb[6].mxu1 }
 0x2cc   : > { %v1069_v33 = vmax.f32 %v930_v27, %v934_v31  ;;  %v1083_v34 = vmax.f32 %v973_v28, %v977_v32  ;;  %v936_v35 = vpop.f32.mrb[7].mxu0  ;;  %v979_v36 = vpop.f32.mrb[7].mxu1 }
 0x2cd   : > { %v1076_v37 = vmax.f32 %v932_v29, %v936_v35  ;;  %v1090_v39 = vmax.f32 %v975_v30, %v979_v36 }
 0x2ce   : > { %v1070_v40 = vrot.slane %v1069_v33, 4  ;;  %v1084_v41 = vrot.slane %v1083_v34, 4 }
 0x2cf   : > { %v1077_v42 = vrot.slane %v1076_v37, 4  ;;  %v1091_v43 = vrot.slane %v1090_v39, 4 }
 0x2d0   : > { %v1071_v44 = vmax.f32 %v1069_v33, %v1070_v40  ;;  %v1085_v45 = vmax.f32 %v1083_v34, %v1084_v41 }
 0x2d1   : > { %v1078_v46 = vmax.f32 %v1076_v37, %v1077_v42  ;;  %v1092_v49 = vmax.f32 %v1090_v39, %v1091_v43 }
 0x2d2   : > { %v1072_v50 = vrot.slane %v1071_v44, 2  ;;  %v1086_v51 = vrot.slane %v1085_v45, 2 }
 0x2d3   : > { %v1079_v52 = vrot.slane %v1078_v46, 2  ;;  %v1093_v53 = vrot.slane %v1092_v49, 2 }
 0x2d4   : > { %v1073_v54 = vmax.f32 %v1071_v44, %v1072_v50  ;;  %v1087_v55 = vmax.f32 %v1085_v45, %v1086_v51 }
 0x2d5   : > { %v1080_v56 = vmax.f32 %v1078_v46, %v1079_v52  ;;  %v1094_v59 = vmax.f32 %v1092_v49, %v1093_v53  ;;  %v1189_v53 = vld [vmem:[%s1831_s6] sm:$0xff] }
 0x2d6   : > { %v1074_v60 = vrot.slane %v1073_v54, 1  ;;  %v1088_v61 = vrot.slane %v1087_v55, 1 }
 0x2d7   : > { %v1081_v62 = vrot.slane %v1080_v56, 1  ;;  %v1095_v63 = vrot.slane %v1094_v59, 1 }
 0x2d8   : > { %v1075_v0 = vmax.f32 %v1073_v54, %v1074_v60  ;;  %v1089_v1 = vmax.f32 %v1087_v55, %v1088_v61 }
 0x2d9   : > { %v1082_v2 = vmax.f32 %v1080_v56, %v1081_v62  ;;  %v1096_v4 = vmax.f32 %v1094_v59, %v1095_v63 }
 0x2db   : > { %v1133_v5 = vcombine.low %v1075_v0, %v1082_v2  ;;  %v1134_v6 = vcombine.low %v1089_v1, %v1096_v4 }
 0x2dd   : > { %v1143_v7 = vrot.slane %v1133_v5, %v1142_v3  ;;  %v1150_v8 = vrot.slane %v1134_v6, %v1142_v3 }
 0x2df   : > { %v1165_v9 = vcombine.low %v1143_v7, %v1150_v8 }
 0x2e1   : > { %v1173_v51 = vrot.slane %v1165_v9, %v1142_v3 }
 0x2e9   : > { %v1016_v10 = vpop.f32.mrb[8].mxu0  ;;  %v1059_v11 = vpop.f32.mrb[8].mxu1 }
 0x2ea   : > { %v1018_v12 = vpop.f32.mrb[9].mxu0  ;;  %v1061_v13 = vpop.f32.mrb[9].mxu1 }
 0x2eb   : > { %v1020_v14 = vpop.f32.mrb[10].mxu0  ;;  %v1063_v15 = vpop.f32.mrb[10].mxu1 }
 0x2ec   : > { %v1097_v16 = vmax.f32 %v1016_v10, %v1020_v14  ;;  %v1111_v17 = vmax.f32 %v1059_v11, %v1063_v15  ;;  %v1022_v18 = vpop.f32.mrb[11].mxu0  ;;  %v1065_v19 = vpop.f32.mrb[11].mxu1 }
 0x2ed   : > { %v1104_v20 = vmax.f32 %v1018_v12, %v1022_v18  ;;  %v1118_v21 = vmax.f32 %v1061_v13, %v1065_v19 }
 0x2ee   : > { %v1098_v22 = vrot.slane %v1097_v16, 4  ;;  %v1112_v23 = vrot.slane %v1111_v17, 4 }
 0x2ef   : > { %v1105_v24 = vrot.slane %v1104_v20, 4  ;;  %v1119_v25 = vrot.slane %v1118_v21, 4 }
 0x2f0   : > { %v1099_v26 = vmax.f32 %v1097_v16, %v1098_v22  ;;  %v1113_v27 = vmax.f32 %v1111_v17, %v1112_v23 }
 0x2f1   : > { %v1106_v28 = vmax.f32 %v1104_v20, %v1105_v24  ;;  %v1120_v29 = vmax.f32 %v1118_v21, %v1119_v25 }
 0x2f2   : > { %v1100_v30 = vrot.slane %v1099_v26, 2  ;;  %v1114_v31 = vrot.slane %v1113_v27, 2 }
 0x2f3   : > { %v1107_v32 = vrot.slane %v1106_v28, 2  ;;  %v1121_v33 = vrot.slane %v1120_v29, 2 }
 0x2f4   : > { %v1101_v34 = vmax.f32 %v1099_v26, %v1100_v30  ;;  %v1115_v35 = vmax.f32 %v1113_v27, %v1114_v31 }
 0x2f5   : > { %v1108_v36 = vmax.f32 %v1106_v28, %v1107_v32  ;;  %v1122_v37 = vmax.f32 %v1120_v29, %v1121_v33 }
 0x2f6   : > { %v1102_v39 = vrot.slane %v1101_v34, 1  ;;  %v1116_v40 = vrot.slane %v1115_v35, 1 }
 0x2f7   : > { %v1109_v41 = vrot.slane %v1108_v36, 1  ;;  %v1123_v42 = vrot.slane %v1122_v37, 1 }
 0x2f8   : > { %v1103_v43 = vmax.f32 %v1101_v34, %v1102_v39  ;;  %v1117_v44 = vmax.f32 %v1115_v35, %v1116_v40 }
 0x2f9   : > { %v1110_v45 = vmax.f32 %v1108_v36, %v1109_v41  ;;  %v1124_v46 = vmax.f32 %v1122_v37, %v1123_v42 }
 0x2fb   : > { %v1135_v38 = vcombine.low %v1103_v43, %v1110_v45  ;;  %v1136_v47 = vcombine.low %v1117_v44, %v1124_v46 }
 0x2fd   : > { %v1157_v48 = vrot.slane %v1135_v38, %v1142_v3  ;;  %v1164_v49 = vrot.slane %v1136_v47, %v1142_v3 }
 0x2ff   : > { %v1166_v50 = vcombine.low %v1157_v48, %v1164_v49 }
 0x301   : > { %v1180_v52 = vrot.slane %v1166_v50, %v1142_v3 }
 0x303   : > { %v1181_v54 = vcombine.low %v1173_v51, %v1180_v52 }
 0x305   : > { %v1190_v55 = vadd.f32 %v1189_v53, %v1181_v54 }
 0x307   : > { %v1191_v56 = vmax.f32 %v1190_v55, 0.0 }
 0x309   : > { %1192 = vst [vmem:[%s309_s21] sm:$0xff] %v1191_v56 }
 0x30a   : > { %1526 = shalt.err (!%p1523_p6)
}
 0x30b   : > { %s1527_s10 = scalar_lea.hbm %s1778_s30, 128  ;;  %s1531_s20 = scalar_lea.hbm %s1832_s7, 256 }
 0x30c   : > { %p1528_p7 = scmp.ne.s32.totalorder %s1778_s30, %s1527_s10  ;;  %p1532_p0 = scmp.lt.u32.totalorder %s1778_s30, %s1832_s7 }
 0x30d   : > { %p1533_p2 = scmp.lt.u32.totalorder %s1531_s20, %s1527_s10  ;;  %p1535_p8 = scmp.lt.u32.totalorder %s1527_s10, %s1778_s30 }
 0x30e   : > { %p1529_p9 = pnand %p1528_p7, %p1844_p10 }
 0x30f   : > { %p1534_p4 = por %p1533_p2, %p1532_p0 }
 0x310   : > { %p1530_p12 = pneg %p1529_p9 }
 0x311   : > { %p1536_p11 = por %p1535_p8, %p1534_p4 }
 0x313   : > { %p1537_p13 = pnand %p1536_p11, %p1530_p12 }
 0x315   : > { %1540 = shalt.err (!%p1537_p13)
}
 0x316   : > { %1413 = dma.vmem_to_hbm [thread:$0]  (%p1844_p10), %s1780_s23, 128, %s1778_s30, %s1194_s8  }
 0x317 PF: > { %p1425_p1 = scmp.ge.s32.totalorder %s1595_s29, 2  ;;  %s1220_s19 = sand.u32 1, %s1575_s24  }
 0x318   : > { %p1845_p3 = scmp.ne.s32.totalorder %s1838_s13, 0  ;;  %s1221_s18 = scalar_lea.sflag [#allocation5], %s1220_s19 }
 0x31a   : > { %p1420_p5 = pnand %p1425_p1, %p1845_p3 }
 0x31c   : > { %1570 = dma.done.wait (!%p1420_p5), %s1221_s18, 128  }
 0x31d   : > { %1572 = vsyncadd (!%p1420_p5), %s1221_s18, 4294967168  ;;  %s21_s29 = sadd.s32 1, %s1595_s29   ;;  %s1846_s24 = smov %s1579_s25 }
 0x31e   : > { %p18_p6 = scmp.ge.s32.totalorder %s21_s29, 4   ;;  %s1847_s25 = smov %s1583_s26 }
 0x31f   : > { %s1848_s26 = smov %s1698_s14  ;;  %s1849_s27 = smov %s1591_s28 }
 0x320   : > { %s1850_s28 = smov %s1852_s9  ;;  %20 = sbr.rel (!%p18_p6) target bundleno = 5 (0x5), region = 96 }
 0x327   :  { %1226 = vsyncpa [#allocation4], 1 }
 0x328   :  { %1228 = vsyncpa [#allocation4 + $0x1], 1 }
 0x329   :  { %1229 = vsyncpa [#allocation5], 1 }
 0x32a   :  { %1231 = vsyncpa [#allocation5 + $0x1], 1 }

</bundles_post_ra>
